<compile_context>
chip_gen: v7x
topology: tpu7x:2x2x1
jax: 0.10.0
libtpu: 0.0.40
codegen_flags: <defaults>
</compile_context>

<pallas_src>
import functools

import jax
import jax.numpy as jnp
import numpy as np
from jax import lax
from jax.experimental import pallas as pl
from jax.experimental.pallas import tpu as pltpu


def _ppo_actor_kernel(obs_ref, w1_ref, b1_ref, w2_ref, b2_ref, wl_ref, bl_ref,
                      lp_ref, z_ref, *, hidden_width, num_actions):
    H = hidden_width
    A = num_actions

    x = obs_ref[...]                                                   # (Bt, D) native layout

    # hidden layer 1: LayDense(D, H) with ReLU.
    # Contract D-with-D (== W1 @ x^T) so the result lands batch-on-lanes (H, Bt)
    # without any HBM-side transpose of obs.
    h1 = lax.dot_general(w1_ref[...], x,
                         dimension_numbers=(((1,), (1,)), ((), ())),
                         preferred_element_type=jnp.float32) + b1_ref[...]
    h1 = jnp.maximum(h1, 0.0)                                          # (H, Bt)
    z1 = (h1 == 0.0).astype(jnp.bfloat16)                              # dead-ReLU indicator

    # hidden layer 2: LayDense(H, H) with ReLU
    h2 = jnp.dot(w2_ref[...], h1, preferred_element_type=jnp.float32) + b2_ref[...]
    h2 = jnp.maximum(h2, 0.0)                                          # (H, Bt)
    z2 = (h2 == 0.0).astype(jnp.bfloat16)

    # logits head: LayDense(H, A), no activation
    logits = jnp.dot(wl_ref[...], h2, preferred_element_type=jnp.float32) + bl_ref[...]  # (A, Bt)

    # Categorical(logits): probs = softmax, entropy = -sum(p * log p)
    m = jnp.max(logits, axis=0, keepdims=True)                         # (1, Bt)
    shifted = logits - m
    e = jnp.exp(shifted)
    s = jnp.sum(e, axis=0, keepdims=True)                              # (1, Bt)
    inv_s = pl.reciprocal(s, approx=True)                              # EUP, ~1e-6 rel err
    probs = e * inv_s                                                  # (A, Bt)
    entropy = jnp.log(s) - jnp.sum(probs * shifted, axis=0, keepdims=True)  # (1, Bt)

    # Coalesced stores: one aligned 8-row store, one 1-row masked store.
    lp_ref[0:2 * A, :] = jnp.concatenate([logits, probs], axis=0)      # rows 0..2A-1
    lp_ref[2 * A:2 * A + 1, :] = entropy                               # row 2A

    # Single full-block bf16 store for dead-ReLU indicators (values are 0/1 -> exact).
    z_ref[...] = jnp.concatenate([z1, z2], axis=0)                     # (2H, Bt)


def ppo_actor_forward(obs, params, *, b_tile=None):
    """Full PPOActorModule forward in one grid-tiled Pallas kernel.

    params: torch-layout (W1(out,in), b1(out,), W2, b2, Wl, bl).
    b_tile (multiple of 128) is auto-chosen if None: at least 2 grid steps when
    B > 128 (v7x megacore), capped at 2048 (well inside v5e scoped VMEM).
    """
    w1, b1, w2, b2, wl, bl = params
    B, D = obs.shape
    H = w1.shape[0]
    A = wl.shape[0]
    RL = 2 * A + 1                 # logits + probs + entropy rows
    RZ = 2 * H                     # dead-ReLU indicator rows

    if b_tile is None:
        b_tile = min(2048, 128 * pl.cdiv(pl.cdiv(B, 2), 128))
    b_tile = max(128, int(b_tile))
    assert b_tile % 128 == 0, "b_tile must be a multiple of the 128-lane width"

    B_pad = b_tile * pl.cdiv(B, b_tile)
    obs_f = obs.astype(jnp.float32)
    if B_pad != B:                 # zero-pad batch rows only when needed (no transpose)
        obs_f = jnp.pad(obs_f, ((0, B_pad - B), (0, 0)))

    kern = functools.partial(_ppo_actor_kernel, hidden_width=H, num_actions=A)

    # Advisory cost: tiny mem-bound custom call.
    cost = pl.CostEstimate(
        flops=2 * B_pad * (D * H + H * H + H * A),
        transcendentals=B_pad * (A + 2),
        bytes_accessed=B_pad * (4 * D + 4 * RL + 2 * RZ)
                       + 4 * (H * D + H + H * H + H + A * H + A),
    )

    lp_slab, z_slab = pl.pallas_call(
        kern,
        out_shape=(jax.ShapeDtypeStruct((RL, B_pad), jnp.float32),
                   jax.ShapeDtypeStruct((RZ, B_pad), jnp.bfloat16)),
        grid_spec=pltpu.PrefetchScalarGridSpec(
            num_scalar_prefetch=0,
            grid=(B_pad // b_tile,),
            in_specs=[
                pl.BlockSpec((b_tile, D), lambda i: (i, 0)),   # obs tile, native (B, D)
                pl.BlockSpec((H, D), lambda i: (0, 0)),        # W1 (VMEM-resident)
                pl.BlockSpec((H, 1), lambda i: (0, 0)),        # b1
                pl.BlockSpec((H, H), lambda i: (0, 0)),        # W2
                pl.BlockSpec((H, 1), lambda i: (0, 0)),        # b2
                pl.BlockSpec((A, H), lambda i: (0, 0)),        # W_logits
                pl.BlockSpec((A, 1), lambda i: (0, 0)),        # b_logits
            ],
            out_specs=[
                pl.BlockSpec((RL, b_tile), lambda i: (0, i)),  # logits/probs/entropy slab
                pl.BlockSpec((RZ, b_tile), lambda i: (0, i)),  # z1/z2 slab (bf16)
            ],
        ),
        compiler_params=pltpu.CompilerParams(
            dimension_semantics=("parallel",),                 # megacore sharding on v7x
        ),
        cost_estimate=cost,
    )(obs_f,
      w1.astype(jnp.float32), jnp.reshape(b1, (H, 1)).astype(jnp.float32),
      w2.astype(jnp.float32), jnp.reshape(b2, (H, 1)).astype(jnp.float32),
      wl.astype(jnp.float32), jnp.reshape(bl, (A, 1)).astype(jnp.float32))

    # Epilogue: ONE transpose per slab, then views of the transposed result.
    lp_t = lp_slab[:, :B].T                        # (B, 2A+1)
    logits = lp_t[:, 0:A]                          # (B, A)
    probs = lp_t[:, A:2 * A]                       # (B, A)
    entropy = lp_t[:, 2 * A]                       # (B,)

    z_t = z_slab[:, :B].T.astype(jnp.float32)      # (B, 2H) — single pass over indicators
    zeroes = jnp.concatenate([z_t[:, :H].reshape(-1),      # torch.cat([z1.flatten(),
                              z_t[:, H:].reshape(-1)])     #            z2.flatten()])

    return {"logits": logits, "probs": probs, "entropy": entropy, "zeroes": zeroes}


# jit the wrapper so the (tiny) epilogue fuses with the pallas_call's consumers.
ppo_actor_forward_jit = jax.jit(ppo_actor_forward, static_argnames=("b_tile",))


def ppo_actor_reference(obs, params):
    """Pure-JAX reference mirroring the torch module (for correctness check)."""
    w1, b1, w2, b2, wl, bl = params
    h1 = jnp.maximum(obs @ w1.T + b1, 0.0)
    h2 = jnp.maximum(h1 @ w2.T + b2, 0.0)
    logits = h2 @ wl.T + bl
    m = jnp.max(logits, axis=-1, keepdims=True)
    e = jnp.exp(logits - m)
    s = jnp.sum(e, axis=-1, keepdims=True)
    probs = e / s
    logp = (logits - m) - jnp.log(s)
    entropy = -jnp.sum(probs * logp, axis=-1)
    z1 = (h1 == 0.0).astype(jnp.float32)
    z2 = (h2 == 0.0).astype(jnp.float32)
    return {"logits": logits, "probs": probs, "entropy": entropy,
            "zeroes": jnp.concatenate([z1.reshape(-1), z2.reshape(-1)])}


def init_params(key, observation_width, hidden_width, num_actions):
    """Deterministic synthetic init; shapes follow torch nn.Linear (out, in)."""
    k = jax.random.split(key, 6)
    s = 0.1
    w1 = s * jax.random.normal(k[0], (hidden_width, observation_width), jnp.float32)
    b1 = s * jax.random.normal(k[1], (hidden_width,), jnp.float32)
    w2 = s * jax.random.normal(k[2], (hidden_width, hidden_width), jnp.float32)
    b2 = s * jax.random.normal(k[3], (hidden_width,), jnp.float32)
    wl = s * jax.random.normal(k[4], (num_actions, hidden_width), jnp.float32)
    bl = s * jax.random.normal(k[5], (num_actions,), jnp.float32)
    return (w1, b1, w2, b2, wl, bl)


if __name__ == "__main__":
    OBS_WIDTH = 16      # observation_width
    HIDDEN = 12         # hidden_width (module default)
    NUM_ACTIONS = 4

    key = jax.random.PRNGKey(0)
    k_obs, k_obs2, k_par = jax.random.split(key, 3)
    params = init_params(k_par, OBS_WIDTH, HIDDEN, NUM_ACTIONS)

    def check(out, ref, batch):
        assert out["logits"].shape == (batch, NUM_ACTIONS)
        assert out["probs"].shape == (batch, NUM_ACTIONS)
        assert out["entropy"].shape == (batch,)
        assert out["zeroes"].shape == (2 * batch * HIDDEN,)
        np.testing.assert_allclose(np.asarray(out["logits"]), np.asarray(ref["logits"]), atol=1e-4)
        np.testing.assert_allclose(np.asarray(out["probs"]), np.asarray(ref["probs"]), atol=1e-3)
        np.testing.assert_allclose(np.asarray(out["entropy"]), np.asarray(ref["entropy"]), atol=1e-3)
        np.testing.assert_allclose(np.asarray(out["zeroes"]), np.asarray(ref["zeroes"]), atol=0.0)

    # --- small demo batch (single 128-lane tile) ---
    BATCH = 8
    obs = jax.random.normal(k_obs, (BATCH, OBS_WIDTH), jnp.float32)
    out = ppo_actor_forward_jit(obs, params)
    jax.block_until_ready(out)
    check(out, ppo_actor_reference(obs, params), BATCH)

    # --- larger batch exercising a multi-step "parallel" grid (>=2 tiles) ---
    BATCH2 = 300
    obs2 = jax.random.normal(k_obs2, (BATCH2, OBS_WIDTH), jnp.float32)
    out2 = ppo_actor_forward_jit(obs2, params)          # auto b_tile=256 -> 2 grid steps
    jax.block_until_ready(out2)
    check(out2, ppo_actor_reference(obs2, params), BATCH2)

    # --- explicit small tile to exercise 3 grid steps + ragged pad path ---
    out3 = ppo_actor_forward(obs2, params, b_tile=128)
    jax.block_until_ready(out3)
    check(out3, ppo_actor_reference(obs2, params), BATCH2)

    print("KERNEL_OK")
</pallas_src>

<mosaic_0001>
module attributes {stable_mosaic.version = 11 : i64} {
  func.func @_ppo_actor_kernel(%arg0: i32, %arg1: memref<128x16xf32, #tpu.memory_space<vmem>>, %arg2: memref<12x16xf32, #tpu.memory_space<vmem>>, %arg3: memref<12x1xf32, #tpu.memory_space<vmem>>, %arg4: memref<12x12xf32, #tpu.memory_space<vmem>>, %arg5: memref<12x1xf32, #tpu.memory_space<vmem>>, %arg6: memref<4x12xf32, #tpu.memory_space<vmem>>, %arg7: memref<4x1xf32, #tpu.memory_space<vmem>>, %arg8: memref<9x128xf32, #tpu.memory_space<vmem>>, %arg9: memref<24x128xbf16, #tpu.memory_space<vmem>>) attributes {dimension_semantics = [#tpu.dimension_semantics<parallel>], iteration_bounds = array<i64: 1>, scalar_prefetch = 0 : i64, scratch_operands = 0 : i64, tpu.core_type = #tpu.core_type<tc>, window_params = [{transform_indices = @transform_0, window_bounds = array<i64: 128, 16>}, {pipeline_mode = #tpu.pipeline_mode<synchronous>, transform_indices = @transform_1, window_bounds = array<i64: 12, 16>}, {pipeline_mode = #tpu.pipeline_mode<synchronous>, transform_indices = @transform_2, window_bounds = array<i64: 12, 1>}, {pipeline_mode = #tpu.pipeline_mode<synchronous>, transform_indices = @transform_3, window_bounds = array<i64: 12, 12>}, {pipeline_mode = #tpu.pipeline_mode<synchronous>, transform_indices = @transform_4, window_bounds = array<i64: 12, 1>}, {pipeline_mode = #tpu.pipeline_mode<synchronous>, transform_indices = @transform_5, window_bounds = array<i64: 4, 12>}, {pipeline_mode = #tpu.pipeline_mode<synchronous>, transform_indices = @transform_6, window_bounds = array<i64: 4, 1>}, {transform_indices = @transform_7, window_bounds = array<i64: 9, 128>}, {transform_indices = @transform_8, window_bounds = array<i64: 24, 128>}]} {
    %c0 = arith.constant 0 : index
    %c0_0 = arith.constant 0 : index
    %0 = vector.load %arg1[%c0, %c0_0] : memref<128x16xf32, #tpu.memory_space<vmem>>, vector<128x16xf32>
    %c0_1 = arith.constant 0 : index
    %c0_2 = arith.constant 0 : index
    %1 = vector.load %arg2[%c0_1, %c0_2] : memref<12x16xf32, #tpu.memory_space<vmem>>, vector<12x16xf32>
    %cst = arith.constant dense<0.000000e+00> : vector<12x128xf32>
    %2 = tpu.matmul %1, %0, %cst {dimension_numbers = #tpu.dot_dimension_numbers<[1], [1], [0], [0], [0, 0, 1, 0], [], []>} : vector<12x16xf32>, vector<128x16xf32>, vector<12x128xf32> -> vector<12x128xf32>
    %c0_3 = arith.constant 0 : index
    %c0_4 = arith.constant 0 : index
    %3 = vector.load %arg3[%c0_3, %c0_4] : memref<12x1xf32, #tpu.memory_space<vmem>>, vector<12x1xf32>
    %4 = vector.broadcast %3 : vector<12x1xf32> to vector<12x128xf32>
    %5 = arith.addf %2, %4 : vector<12x128xf32>
    %cst_5 = arith.constant 0.000000e+00 : f32
    %6 = vector.broadcast %cst_5 : f32 to vector<12x128xf32>
    %7 = arith.maximumf %5, %6 : vector<12x128xf32>
    %cst_6 = arith.constant 0.000000e+00 : f32
    %8 = vector.broadcast %cst_6 : f32 to vector<12x128xf32>
    %9 = arith.cmpf oeq, %7, %8 : vector<12x128xf32>
    %10 = arith.extui %9 : vector<12x128xi1> to vector<12x128xi32>
    %11 = arith.sitofp %10 : vector<12x128xi32> to vector<12x128xf32>
    %12 = arith.truncf %11 : vector<12x128xf32> to vector<12x128xbf16>
    %c0_7 = arith.constant 0 : index
    %c0_8 = arith.constant 0 : index
    %13 = vector.load %arg4[%c0_7, %c0_8] : memref<12x12xf32, #tpu.memory_space<vmem>>, vector<12x12xf32>
    %cst_9 = arith.constant dense<0.000000e+00> : vector<12x128xf32>
    %14 = tpu.matmul %13, %7, %cst_9 {dimension_numbers = #tpu.dot_dimension_numbers<[1], [0], [0], [1], [0, 0, 1, 1], [], []>} : vector<12x12xf32>, vector<12x128xf32>, vector<12x128xf32> -> vector<12x128xf32>
    %c0_10 = arith.constant 0 : index
    %c0_11 = arith.constant 0 : index
    %15 = vector.load %arg5[%c0_10, %c0_11] : memref<12x1xf32, #tpu.memory_space<vmem>>, vector<12x1xf32>
    %16 = vector.broadcast %15 : vector<12x1xf32> to vector<12x128xf32>
    %17 = arith.addf %14, %16 : vector<12x128xf32>
    %cst_12 = arith.constant 0.000000e+00 : f32
    %18 = vector.broadcast %cst_12 : f32 to vector<12x128xf32>
    %19 = arith.maximumf %17, %18 : vector<12x128xf32>
    %cst_13 = arith.constant 0.000000e+00 : f32
    %20 = vector.broadcast %cst_13 : f32 to vector<12x128xf32>
    %21 = arith.cmpf oeq, %19, %20 : vector<12x128xf32>
    %22 = arith.extui %21 : vector<12x128xi1> to vector<12x128xi32>
    %23 = arith.sitofp %22 : vector<12x128xi32> to vector<12x128xf32>
    %24 = arith.truncf %23 : vector<12x128xf32> to vector<12x128xbf16>
    %c0_14 = arith.constant 0 : index
    %c0_15 = arith.constant 0 : index
    %25 = vector.load %arg6[%c0_14, %c0_15] : memref<4x12xf32, #tpu.memory_space<vmem>>, vector<4x12xf32>
    %cst_16 = arith.constant dense<0.000000e+00> : vector<4x128xf32>
    %26 = tpu.matmul %25, %19, %cst_16 {dimension_numbers = #tpu.dot_dimension_numbers<[1], [0], [0], [1], [0, 0, 1, 1], [], []>} : vector<4x12xf32>, vector<12x128xf32>, vector<4x128xf32> -> vector<4x128xf32>
    %c0_17 = arith.constant 0 : index
    %c0_18 = arith.constant 0 : index
    %27 = vector.load %arg7[%c0_17, %c0_18] : memref<4x1xf32, #tpu.memory_space<vmem>>, vector<4x1xf32>
    %28 = vector.broadcast %27 : vector<4x1xf32> to vector<4x128xf32>
    %29 = arith.addf %26, %28 : vector<4x128xf32>
    %cst_19 = arith.constant dense<0xFF800000> : vector<128xf32>
    %30 = vector.multi_reduction <maximumf>, %29, %cst_19 [0] : vector<4x128xf32> to vector<128xf32>
    %31 = vector.shape_cast %30 : vector<128xf32> to vector<1x128xf32>
    %32 = vector.broadcast %31 : vector<1x128xf32> to vector<4x128xf32>
    %33 = arith.subf %29, %32 : vector<4x128xf32>
    %34 = math.exp %33 : vector<4x128xf32>
    %cst_20 = arith.constant dense<0.000000e+00> : vector<128xf32>
    %35 = vector.multi_reduction <add>, %34, %cst_20 [0] : vector<4x128xf32> to vector<128xf32>
    %36 = vector.shape_cast %35 : vector<128xf32> to vector<1x128xf32>
    %37 = tpu.reciprocal %36 {approx = true} : vector<1x128xf32> -> vector<1x128xf32>
    %38 = vector.broadcast %37 : vector<1x128xf32> to vector<4x128xf32>
    %39 = arith.mulf %34, %38 : vector<4x128xf32>
    %40 = math.log %36 : vector<1x128xf32>
    %41 = arith.mulf %39, %33 : vector<4x128xf32>
    %cst_21 = arith.constant dense<0.000000e+00> : vector<128xf32>
    %42 = vector.multi_reduction <add>, %41, %cst_21 [0] : vector<4x128xf32> to vector<128xf32>
    %43 = vector.shape_cast %42 : vector<128xf32> to vector<1x128xf32>
    %44 = arith.subf %40, %43 : vector<1x128xf32>
    %45 = tpu.concatenate %29, %39 in 0 : vector<4x128xf32>, vector<4x128xf32> -> vector<8x128xf32>
    %c0_22 = arith.constant 0 : index
    %c0_23 = arith.constant 0 : index
    %46 = vector.load %arg8[%c0_22, %c0_23] : memref<9x128xf32, #tpu.memory_space<vmem>>, vector<8x128xf32>
    tpu.vector_store %arg8[%c0_22, %c0_23], %45 {strides = array<i32>} : memref<9x128xf32, #tpu.memory_space<vmem>>, vector<8x128xf32>,
    %c8 = arith.constant 8 : index
    %c0_24 = arith.constant 0 : index
    %47 = vector.load %arg8[%c8, %c0_24] : memref<9x128xf32, #tpu.memory_space<vmem>>, vector<1x128xf32>
    tpu.vector_store %arg8[%c8, %c0_24], %44 {strides = array<i32>} : memref<9x128xf32, #tpu.memory_space<vmem>>, vector<1x128xf32>,
    %48 = tpu.concatenate %12, %24 in 0 : vector<12x128xbf16>, vector<12x128xbf16> -> vector<24x128xbf16>
    %c0_25 = arith.constant 0 : index
    %c0_26 = arith.constant 0 : index
    %49 = vector.load %arg9[%c0_25, %c0_26] : memref<24x128xbf16, #tpu.memory_space<vmem>>, vector<24x128xbf16>
    tpu.vector_store %arg9[%c0_25, %c0_26], %48 {strides = array<i32>} : memref<24x128xbf16, #tpu.memory_space<vmem>>, vector<24x128xbf16>,
    return
  }
  func.func @transform_0(%arg0: i32) -> (i32, i32) {
    %c0_i32 = arith.constant 0 : i32
    %c0_i32_0 = arith.constant 0 : i32
    return %arg0, %c0_i32 : i32, i32
  }
  func.func @transform_1(%arg0: i32) -> (i32, i32) {
    %c0_i32 = arith.constant 0 : i32
    %c0_i32_0 = arith.constant 0 : i32
    %c0_i32_1 = arith.constant 0 : i32
    return %c0_i32, %c0_i32_0 : i32, i32
  }
  func.func @transform_2(%arg0: i32) -> (i32, i32) {
    %c0_i32 = arith.constant 0 : i32
    %c0_i32_0 = arith.constant 0 : i32
    %c0_i32_1 = arith.constant 0 : i32
    return %c0_i32, %c0_i32_0 : i32, i32
  }
  func.func @transform_3(%arg0: i32) -> (i32, i32) {
    %c0_i32 = arith.constant 0 : i32
    %c0_i32_0 = arith.constant 0 : i32
    %c0_i32_1 = arith.constant 0 : i32
    return %c0_i32, %c0_i32_0 : i32, i32
  }
  func.func @transform_4(%arg0: i32) -> (i32, i32) {
    %c0_i32 = arith.constant 0 : i32
    %c0_i32_0 = arith.constant 0 : i32
    %c0_i32_1 = arith.constant 0 : i32
    return %c0_i32, %c0_i32_0 : i32, i32
  }
  func.func @transform_5(%arg0: i32) -> (i32, i32) {
    %c0_i32 = arith.constant 0 : i32
    %c0_i32_0 = arith.constant 0 : i32
    %c0_i32_1 = arith.constant 0 : i32
    return %c0_i32, %c0_i32_0 : i32, i32
  }
  func.func @transform_6(%arg0: i32) -> (i32, i32) {
    %c0_i32 = arith.constant 0 : i32
    %c0_i32_0 = arith.constant 0 : i32
    %c0_i32_1 = arith.constant 0 : i32
    return %c0_i32, %c0_i32_0 : i32, i32
  }
  func.func @transform_7(%arg0: i32) -> (i32, i32) {
    %c0_i32 = arith.constant 0 : i32
    %c0_i32_0 = arith.constant 0 : i32
    return %c0_i32, %arg0 : i32, i32
  }
  func.func @transform_8(%arg0: i32) -> (i32, i32) {
    %c0_i32 = arith.constant 0 : i32
    %c0_i32_0 = arith.constant 0 : i32
    return %c0_i32, %arg0 : i32, i32
  }
}

</mosaic_0001>

<bundles_post_ra>
// kernel: ppo_actor_forward.1
= control target key start
LH: loop header
LB: loop body
LE: loop exit
PB: predicated region body
PF: predicated region fallthrough
CT: control target
= control target key end

     0   :  { %vm58_vm0 = vcmask 130048   ;;  %v627_v3 = vmov 0   ;;  %vm211_vm2 = vcmask 97280   ;;  %vm218_vm3 = vcmask 1043456   ;;  %s828_s0 = inlined_call_operand.vmem [shape: f32[128,16], index: 0, kind: input, shape index: {}]   ;;  %s829_s1 = inlined_call_operand.vmem [shape: f32[12,16], index: 1, kind: input, shape index: {}]   ;;  %s830_s2 = inlined_call_operand.vmem [shape: f32[12,1], index: 2, kind: input, shape index: {}]   ;;  %s831_s6 = inlined_call_operand.vmem [shape: f32[4,1], index: 6, kind: input, shape index: {}]   ;;  %s832_s3 = inlined_call_operand.vmem [shape: f32[12,12], index: 3, kind: input, shape index: {}]   ;;  %s833_s4 = inlined_call_operand.vmem [shape: f32[12,1], index: 4, kind: input, shape index: {}]   ;;  %s834_s5 = inlined_call_operand.vmem [shape: f32[4,12], index: 5, kind: input, shape index: {}]   ;;  %s835_s8 = inlined_call_operand.vmem [shape: bf16[24,128], index: 8, kind: output, shape index: {1}]   ;;  %s836_s7 = inlined_call_operand.vmem [shape: f32[9,128], index: 7, kind: output, shape index: {0}]  }
   0x1   :  { %v28_v0 = vld [vmem:[%s828_s0] sm:$0xff]  ;;  %v29_v1 = vld [vmem:[%s828_s0 + $0x8] sm:$0xff]  ;;  %vm685_vm1 = vmpackc.low %vm58_vm0, %vm58_vm0  ;;  %619 = vset.pattern.permute.xlu0 %v627_v3  ;;  %620 = vset.pattern.permute.xlu1 %v627_v3  ;;  %vm628_vm5 = vmmov 1   ;;  %v629_v43 = vmov 0.0   ;;  %v630_v49 = vmov 0.0|0.0   ;;  %vm631_vm8 = vmmov 0  }
   0x2   :  { %v556_v4 = vpack.c.bf16 %v29_v1, %v28_v0  ;;  %v30_v5 = vld [vmem:[%s828_s0 + $0x10] sm:$0xff]  ;;  %v31_v6 = vld [vmem:[%s828_s0 + $0x18] sm:$0xff]  ;;  %v44_v8 = vld [vmem:[%s829_s1] sm:$0xff]  ;;  %vm427_vm11 = vcmask 1045504  }
   0x3   :  { %v562_v7 = vpack.c.bf16 %v31_v6, %v30_v5  ;;  %v32_v9 = vld [vmem:[%s828_s0 + $0x20] sm:$0xff]  ;;  %v33_v10 = vld [vmem:[%s828_s0 + $0x28] sm:$0xff]  ;;  %539 = vmatprep.mubr.msk.f32.mxu0 %vm58_vm0, %v44_v8  ;;  %v34_v15 = vld [vmem:[%s828_s0 + $0x30] sm:$0xff] }
   0x4   :  { %558 = vmatprep.subr.msk.bf16.mxu0 %vm685_vm1, %v556_v4  ;;  %v46_v11 = vld [vmem:[%s830_s2] sm:$0xff]  ;;  %v47_v12 = vld [vmem:[%s830_s2 + $0x8] sm:$0xf]  ;;  %v568_v13 = vpack.c.bf16 %v33_v10, %v32_v9  ;;  %v35_v16 = vld [vmem:[%s828_s0 + $0x38] sm:$0xff] }
   0x5   :  { %561 = vmatpush3.bf16.xpose.msk.msra.mxu0 %vm685_vm1, %v556_v4  ;;  %50 = vperm.xlu0 %619, %v46_v11   ;;  %v307_v14 = vld [vmem:[%s831_s6] sm:$0xf]  ;;  %v574_v17 = vpack.c.bf16 %v35_v16, %v34_v15  ;;  %v37_v19 = vld [vmem:[%s828_s0 + $0x48] sm:$0xff]  ;;  %v38_v21 = vld [vmem:[%s828_s0 + $0x50] sm:$0xff] }
   0x6   :  { %564 = vmatprep.subr.msk.bf16.mxu0 %vm685_vm1, %v562_v7  ;;  %v36_v18 = vld [vmem:[%s828_s0 + $0x40] sm:$0xff]  ;;  %v39_v22 = vld [vmem:[%s828_s0 + $0x58] sm:$0xff]  ;;  %v41_v25 = vld [vmem:[%s828_s0 + $0x68] sm:$0xff] }
   0x7   :  { %v580_v20 = vpack.c.bf16 %v37_v19, %v36_v18  ;;  %v586_v23 = vpack.c.bf16 %v39_v22, %v38_v21  ;;  %v40_v24 = vld [vmem:[%s828_s0 + $0x60] sm:$0xff]  ;;  %v42_v27 = vld [vmem:[%s828_s0 + $0x70] sm:$0xff]  ;;  %v43_v28 = vld [vmem:[%s828_s0 + $0x78] sm:$0xff] }
   0x8   :  { %v592_v26 = vpack.c.bf16 %v41_v25, %v40_v24  ;;  %v598_v29 = vpack.c.bf16 %v43_v28, %v42_v27  ;;  %v45_v30 = vld [vmem:[%s829_s1 + $0x8] sm:$0xf]  ;;  %v197_v31 = vld [vmem:[%s832_s3] sm:$0xff]  ;;  %vm791_vm6 = vmpackc.low %vm218_vm3, %vm628_vm5 }
   0x9   :  { %55 = vperm.xlu0 %619, %v47_v12   ;;  %546 = vmatprep.mubr.msk.f32.mxu1 %vm211_vm2, %v197_v31  ;;  %v199_v32 = vld [vmem:[%s833_s4] sm:$0xff]  ;;  %v200_v33 = vld [vmem:[%s833_s4 + $0x8] sm:$0xf] }
   0xa   :  { %203 = vperm.xlu1 %620, %v199_v32   ;;  %v198_v48 = vld [vmem:[%s832_s3 + $0x8] sm:$0xf]  ;;  %v306_v62 = vld [vmem:[%s834_s5] sm:$0xf] }
   0xd   :  { %567 = vmatpush3.bf16.xpose.msk.msra.mxu0 %vm685_vm1, %v562_v7  ;;  %310 = vperm.xlu0 %619, %v307_v14  }
   0xe   :  { %570 = vmatprep.subr.msk.bf16.mxu0 %vm685_vm1, %v568_v13  ;;  %208 = vperm.xlu1 %620, %v200_v33  }
  0x15   :  { %573 = vmatpush3.bf16.xpose.msk.msra.mxu0 %vm685_vm1, %v568_v13 }
  0x16   :  { %576 = vmatprep.subr.msk.bf16.mxu0 %vm685_vm1, %v574_v17 }
  0x1d   :  { %579 = vmatpush3.bf16.xpose.msk.msra.mxu0 %vm685_vm1, %v574_v17 }
  0x1e   :  { %582 = vmatprep.subr.msk.bf16.mxu0 %vm685_vm1, %v580_v20 }
  0x25   :  { %585 = vmatpush3.bf16.xpose.msk.msra.mxu0 %vm685_vm1, %v580_v20 }
  0x26   :  { %588 = vmatprep.subr.msk.bf16.mxu0 %vm685_vm1, %v586_v23 }
  0x2d   :  { %591 = vmatpush3.bf16.xpose.msk.msra.mxu0 %vm685_vm1, %v586_v23 }
  0x2e   :  { %594 = vmatprep.subr.msk.bf16.mxu0 %vm685_vm1, %v592_v26 }
  0x35   :  { %597 = vmatpush3.bf16.xpose.msk.msra.mxu0 %vm685_vm1, %v592_v26 }
  0x36   :  { %600 = vmatprep.subr.msk.bf16.mxu0 %vm685_vm1, %v598_v29 }
  0x3d   :  { %603 = vmatpush3.bf16.xpose.msk.msra.mxu0 %vm685_vm1, %v598_v29 }
  0x44   :  { %540 = vmatmul.mubr.msk.f32.vlgmr.msra.gmra.mrb[0].mxu0 %vm58_vm0, %v45_v30 }
  0x84   :  { %v51_v34 = vpop.permute.xlu0 %50 }
  0x88   :  { %v56_v35 = vpop.permute.xlu0 %55 }
  0x89   :  { %v204_v50 = vpop.permute.xlu1 %203 }
  0x8c   :  { %v311_v4 = vpop.permute.xlu0 %310 }
  0x8d   :  { %v209_v51 = vpop.permute.xlu1 %208 }
 0x117   :  { %v541_v36 = vpop.f32.mrb[0].mxu0 }
 0x118   :  { %v185_v37 = vadd.f32 %v541_v36, %v56_v35  ;;  %v179_v38 = vpop.f32.mrb[1].mxu0 }
 0x119   :  { %v180_v39 = vadd.f32 %v179_v38, %v51_v34 }
 0x11a   :  { %v189_v40 = vmax.f32 %v185_v37, 0.0 }
 0x11b   :  { %v188_v41 = vmax.f32 %v180_v39, 0.0 }
 0x11c   :  { %vm191_vm4 = vcmp.eq.f32.partialorder %v189_v40, 0.0 }
 0x11d   :  { %v471_v44 = vsel %vm191_vm4, 1.0, %v629_v43  ;;  %vm190_vm7 = vcmp.eq.f32.partialorder %v188_v41, 0.0  ;;  %v604_v45 = vpack.c.bf16 %v189_v40, %v188_v41 }
 0x11e   :  { %v470_v46 = vsel %vm190_vm7, 1.0, %v629_v43 }
 0x11f   :  { %v196_v47 = vpack.c.bf16 %v471_v44, %v470_v46  ;;  %606 = vmatprep.subr.msk.bf16.mxu1 %vm791_vm6, %v604_v45 }
 0x120   :  { %609 = vmatpush3.bf16.msk.msra.mxu1 %vm791_vm6, %v604_v45 }
 0x121   :  { %610 = vmatprep.subr.bf16.mxu1 %v630_v49 }
 0x123   :  { %547 = vmatmul.mubr.msk.f32.vlgmr.msra.gmra.mrb[0].mxu1 %vm211_vm2, %v198_v48 }
 0x124   :  { %553 = vmatprep.mubr.msk.f32.mxu1 %vm631_vm8, %v629_v43 }
 0x1f6   :  { %v548_v52 = vpop.f32.mrb[0].mxu1 }
 0x1f7   :  { %v294_v53 = vadd.f32 %v548_v52, %v209_v51  ;;  %v288_v54 = vpop.f32.mrb[1].mxu1 }
 0x1f8   :  { %v289_v55 = vadd.f32 %v288_v54, %v204_v50 }
 0x1f9   :  { %v298_v56 = vmax.f32 %v294_v53, 0.0 }
 0x1fa   :  { %v297_v57 = vmax.f32 %v289_v55, 0.0 }
 0x1fb   :  { %vm300_vm9 = vcmp.eq.f32.partialorder %v298_v56, 0.0 }
 0x1fc   :  { %v476_v58 = vsel %vm300_vm9, 1.0, %v629_v43  ;;  %vm299_vm10 = vcmp.eq.f32.partialorder %v297_v57, 0.0  ;;  %v611_v59 = vpack.c.bf16 %v298_v56, %v297_v57 }
 0x1fd   :  { %v475_v60 = vsel %vm299_vm10, 1.0, %v629_v43 }
 0x1fe   :  { %v305_v61 = vpack.c.bf16 %v476_v58, %v475_v60  ;;  %613 = vmatpush3.bf16.msk.msra.mxu1 %vm791_vm6, %v611_v59 }
 0x200   :  { %v426_v63 = vrot.slane %v305_v61, 2 }
 0x201   :  { %554 = vmatmul.mubr.msk.f32.vlgmr.msra.gmra.mrb[2].mxu1 %vm211_vm2, %v306_v62 }
 0x202   :  { %v430_v0 = vsel %vm427_vm11, %v196_v47, %v426_v63  ;;  %v481_v1 = vcombine.low %v426_v63, %v426_v63 }
 0x203   :  { %v479_v2 = vcombine.low %v430_v0, %v430_v0  ;;  %v480_v3 = vcombine.high %v430_v0, %v430_v0 }
 0x204   :  { %443 = vst [vmem:[%s835_s8 + $0x8] sm:$0xf] %v481_v1 }
 0x205   :  { %441 = vst [vmem:[%s835_s8] sm:$0xf] %v479_v2  ;;  %442 = vst [vmem:[%s835_s8 + $0x4] sm:$0xf] %v480_v3 }
 0x2d4   :  { %v385_v5 = vpop.f32.mrb[2].mxu1 }
 0x2d5   :  { %v386_v6 = vadd.f32 %v385_v5, %v311_v4  ;;  %v555_v7 = vpop.f32.mrb[3].mxu1 }
 0x2d7   :  { %v389_v8 = vsel %vm218_vm3, %v386_v6, -inf }
 0x2d8   :  { %v390_v9 = vrot.slane %v389_v8, 4 }
 0x2da   :  { %v391_v10 = vmax.f32 %v389_v8, %v390_v9 }
 0x2dc   :  { %v392_v11 = vrot.slane %v391_v10, 2 }
 0x2de   :  { %v393_v12 = vmax.f32 %v391_v10, %v392_v11 }
 0x2e0   :  { %v394_v13 = vrot.slane %v393_v12, 1 }
 0x2e2   :  { %v395_v14 = vmax.f32 %v393_v12, %v394_v13 }
 0x2e4   :  { %v396_v15 = vsub.f32 %v386_v6, %v395_v14 }
 0x2e6   :  { %v397_v16 = vmul.f32 1.442695, %v396_v15 }
 0x2e8   :  { %621 = vpow2.f32 %v397_v16 }
 0x2f2   :  { %v622_v17 = vpop.eup %621 }
 0x2f3   :  { %v399_v18 = vsel %vm218_vm3, %v622_v17, 0.0 }
 0x2f4   :  { %v400_v19 = vrot.slane %v399_v18, 4 }
 0x2f6   :  { %v401_v20 = vadd.f32 %v400_v19, %v399_v18 }
 0x2f8   :  { %v402_v21 = vrot.slane %v401_v20, 2 }
 0x2fa   :  { %v403_v22 = vadd.f32 %v402_v21, %v401_v20 }
 0x2fc   :  { %v404_v23 = vrot.slane %v403_v22, 1 }
 0x2fe   :  { %v405_v24 = vadd.f32 %v404_v23, %v403_v22 }
 0x300   :  { %623 = vrcp.f32 %v405_v24 }
 0x301   :  { %625 = vlog2.f32 %v405_v24 }
 0x30a   :  { %v624_v25 = vpop.eup %623 }
 0x30b   :  { %v407_v26 = vmul.f32 %v624_v25, %v622_v17  ;;  %v626_v35 = vpop.eup %625 }
 0x30c   :  { %v409_v37 = vmul.f32 0.6931472, %v626_v35 }
 0x30d   :  { %v410_v27 = vmul.f32 %v407_v26, %v396_v15  ;;  %v420_v28 = vrot.slane %v407_v26, 4 }
 0x30f   :  { %v411_v29 = vsel %vm218_vm3, %v410_v27, 0.0  ;;  %v422_v30 = vsel %vm218_vm3, %v386_v6, %v420_v28 }
 0x310   :  { %v412_v31 = vrot.slane %v411_v29, 4  ;;  %423 = vst [vmem:[%s836_s7] sm:$0xff] %v422_v30 }
 0x312   :  { %v413_v32 = vadd.f32 %v412_v31, %v411_v29 }
 0x314   :  { %v414_v33 = vrot.slane %v413_v32, 2 }
 0x316   :  { %v415_v34 = vadd.f32 %v414_v33, %v413_v32 }
 0x318   :  { %v416_v36 = vrot.slane %v415_v34, 1 }
 0x31a   :  { %v417_v38 = vadd.f32 %v416_v36, %v415_v34 }
 0x31c   :  { %v418_v39 = vsub.f32 %v409_v37, %v417_v38 }
 0x31e   :  { %424 = vst [vmem:[%s836_s7 + $0x8] sm:$0x1] %v418_v39 }

</bundles_post_ra>
